<compile_context>
chip_gen: v7x
topology: tpu7x:2x2x1
jax: 0.10.0
libtpu: 0.0.40
codegen_flags: <defaults>
</compile_context>

<pallas_src>
import jax
import jax.numpy as jnp
from jax import lax
from jax.experimental import pallas as pl
from jax.experimental.pallas import tpu as pltpu


def _round_up(x, m):
    return ((x + m - 1) // m) * m


def mlp_layer_kernel(x_ref, w_ref, b_ref, o_ref):
    # x_ref: (tb, H)  w_ref: (tn, H)  b_ref: (1, tn)  o_ref: (tb, tn)
    # NT contraction on the MXU (x @ W^T tile) with f32 accumulation; this
    # lowers without materializing a transposed weight copy (same pattern as
    # flash-attention q @ k^T).
    y = lax.dot_general(
        x_ref[...],
        w_ref[...],
        dimension_numbers=(((1,), (1,)), ((), ())),
        preferred_element_type=jnp.float32,
    )
    y = y + b_ref[...].astype(jnp.float32)
    o_ref[...] = jnp.tanh(y).astype(o_ref.dtype)


def mlp_layer(features, weight, bias, *, block_b=512, block_n=None,
              compute_dtype=jnp.bfloat16):
    """SimCSE MLPLayer forward: tanh(features @ weight.T + bias).

    features: [..., H]    weight: [H, H] (PyTorch [out, in])    bias: [H]
    compute_dtype: dtype for x / W on the MXU (default bf16 -> 2x HBM savings
      and full-rate MXU); accumulation, bias add and tanh stay in f32.
      Pass jnp.float32 for bit-exact f32 results.
    """
    out_dtype = features.dtype
    *lead, H = features.shape
    assert weight.shape == (H, H) and bias.shape == (H,)

    x = features.reshape(-1, H)
    B = x.shape[0]

    compute = jnp.dtype(compute_dtype) if compute_dtype is not None else jnp.dtype(x.dtype)
    x = x.astype(compute)
    w = weight.astype(compute)
    in_item = compute.itemsize
    out_item = jnp.dtype(out_dtype).itemsize

    # ---- pad hidden dim to a multiple of 128 (lane-dense, unmasked stores) ----
    H_pad = max(128, _round_up(H, 128))
    if H_pad != H:
        x = jnp.pad(x, ((0, 0), (0, H_pad - H)))
        w = jnp.pad(w, ((0, H_pad - H), (0, H_pad - H)))
        bias = jnp.pad(bias, ((0, H_pad - H),))
    b2d = bias.reshape(1, H_pad).astype(jnp.float32)

    # ---- batch tile: bound pad waste; sublane granularity depends on dtype ----
    sub = 8 if in_item >= 4 else (16 if in_item == 2 else 32)
    n_b = max(1, -(-B // block_b))                  # number of batch tiles
    tb = _round_up(-(-B // n_b), sub)               # ~ceil(B / n_b), aligned
    b_pad = _round_up(B, tb)
    if b_pad != B:
        x = jnp.pad(x, ((0, b_pad - B), (0, 0)))
    num_b = b_pad // tb

    # ---- N tile: keep the resident weight slab within a VMEM budget ----
    # (v7x only has 64 MiB VMEM / 32 MiB default scoped limit per TensorCore.)
    weight_budget = 12 << 20
    if block_n is not None:
        tn = block_n
    elif H_pad * H_pad * in_item <= weight_budget:
        tn = H_pad
    else:
        tn = max(128, (weight_budget // (H_pad * in_item)) // 128 * 128)
        while H_pad % tn:
            tn -= 128
    # Give both v7x TensorCores work even for a single-tile pooler batch.
    if block_n is None and num_b * (H_pad // tn) == 1 and H_pad % 256 == 0:
        tn = H_pad // 2
    num_n = H_pad // tn

    # Constant-index weight/bias only need one VMEM buffer; double-buffer when
    # the N axis actually cycles weight tiles.
    if num_n == 1:
        w_spec = pl.BlockSpec((tn, H_pad), lambda j, i: (j, 0),
                              pipeline_mode=pl.Buffered(1))
        b_spec = pl.BlockSpec((1, tn), lambda j, i: (0, j),
                              pipeline_mode=pl.Buffered(1))
        w_bufs = 1
    else:
        w_spec = pl.BlockSpec((tn, H_pad), lambda j, i: (j, 0))
        b_spec = pl.BlockSpec((1, tn), lambda j, i: (0, j))
        w_bufs = 2

    # ---- explicit scoped-VMEM limit sized to the buffers (+headroom) ----
    vmem_bytes = (2 * tb * H_pad * in_item            # pipelined x tiles
                  + 2 * tb * tn * out_item            # pipelined out tiles
                  + w_bufs * tn * H_pad * in_item     # weight slab(s)
                  + 2 * tn * 4)                       # bias
    vmem_limit = int(vmem_bytes * 1.25) + (2 << 20)
    vmem_limit = min(max(vmem_limit, 32 << 20), 64 << 20)

    # Grid: N tiles outer, batch tiles inner -> each weight tile DMA'd once.
    grid = (num_n, num_b)
    out = pl.pallas_call(
        mlp_layer_kernel,
        out_shape=jax.ShapeDtypeStruct((b_pad, H_pad), out_dtype),
        grid_spec=pltpu.PrefetchScalarGridSpec(
            num_scalar_prefetch=0,
            grid=grid,
            in_specs=[
                pl.BlockSpec((tb, H_pad), lambda j, i: (i, 0)),  # activations
                w_spec,                                          # weight tile
                b_spec,                                          # bias row
            ],
            out_specs=pl.BlockSpec((tb, tn), lambda j, i: (i, j)),
        ),
        compiler_params=pltpu.CompilerParams(
            dimension_semantics=("parallel", "parallel"),
            vmem_limit_bytes=vmem_limit,
        ),
    )(x, w, b2d)

    out = out[:B, :H]
    return out.reshape(*lead, H)


if __name__ == "__main__":
    # Small, deterministic synthetic setup: batch=8 "CLS" vectors, hidden=32.
    B, H = 8, 32
    key = jax.random.PRNGKey(0)
    k_x, k_w, k_b = jax.random.split(key, 3)

    features = jax.random.normal(k_x, (B, H), dtype=jnp.float32)
    # Deterministic Linear params (PyTorch layout [out, in]).
    weight = jax.random.normal(k_w, (H, H), dtype=jnp.float32) * 0.05
    bias = jax.random.normal(k_b, (H,), dtype=jnp.float32) * 0.01

    ref = jnp.tanh(features @ weight.T + bias)

    # Default (bf16 x/W on the MXU, f32 accumulate + bias + tanh epilogue).
    out_bf16 = mlp_layer(features, weight, bias)
    jax.block_until_ready(out_bf16)
    assert out_bf16.shape == (B, H)
    assert jnp.allclose(out_bf16, ref, atol=2e-2, rtol=2e-2), "bf16-path mismatch"

    # Full-precision path: tight match against the reference.
    out_f32 = mlp_layer(features, weight, bias, compute_dtype=jnp.float32)
    jax.block_until_ready(out_f32)
    assert out_f32.shape == (B, H)
    assert jnp.allclose(out_f32, ref, atol=1e-5, rtol=1e-5), "f32-path mismatch"

    # Ragged-batch path: B not a multiple of the tile -> wrapper pads & slices.
    B2 = 10
    features2 = jax.random.normal(jax.random.PRNGKey(1), (B2, H), dtype=jnp.float32)
    out2 = mlp_layer(features2, weight, bias, compute_dtype=jnp.float32)
    jax.block_until_ready(out2)
    ref2 = jnp.tanh(features2 @ weight.T + bias)
    assert out2.shape == (B2, H)
    assert jnp.allclose(out2, ref2, atol=1e-5, rtol=1e-5), "ragged-batch mismatch"

    print("KERNEL_OK")
</pallas_src>

<mosaic_0001>
module attributes {stable_mosaic.version = 11 : i64} {
  func.func @mlp_layer_kernel(%arg0: i32, %arg1: i32, %arg2: memref<16x128xbf16, #tpu.memory_space<vmem>>, %arg3: memref<128x128xbf16, #tpu.memory_space<vmem>>, %arg4: memref<1x128xf32, #tpu.memory_space<vmem>>, %arg5: memref<16x128xf32, #tpu.memory_space<vmem>>) attributes {dimension_semantics = [#tpu.dimension_semantics<parallel>, #tpu.dimension_semantics<parallel>], iteration_bounds = array<i64: 1, 1>, scalar_prefetch = 0 : i64, scratch_operands = 0 : i64, tpu.core_type = #tpu.core_type<tc>, window_params = [{transform_indices = @transform_0, window_bounds = array<i64: 16, 128>}, {pipeline_mode = #tpu.pipeline_mode<synchronous>, transform_indices = @transform_1, window_bounds = array<i64: 128, 128>}, {pipeline_mode = #tpu.pipeline_mode<synchronous>, transform_indices = @transform_2, window_bounds = array<i64: 1, 128>}, {transform_indices = @transform_3, window_bounds = array<i64: 16, 128>}]} {
    %c0 = arith.constant 0 : index
    %c0_0 = arith.constant 0 : index
    %0 = vector.load %arg2[%c0, %c0_0] : memref<16x128xbf16, #tpu.memory_space<vmem>>, vector<16x128xbf16>
    %c0_1 = arith.constant 0 : index
    %c0_2 = arith.constant 0 : index
    %1 = vector.load %arg3[%c0_1, %c0_2] : memref<128x128xbf16, #tpu.memory_space<vmem>>, vector<128x128xbf16>
    %cst = arith.constant dense<0.000000e+00> : vector<16x128xf32>
    %2 = tpu.matmul %0, %1, %cst {dimension_numbers = #tpu.dot_dimension_numbers<[1], [1], [0], [0], [0, 0, 1, 0], [], []>} : vector<16x128xbf16>, vector<128x128xbf16>, vector<16x128xf32> -> vector<16x128xf32>
    %c0_3 = arith.constant 0 : index
    %c0_4 = arith.constant 0 : index
    %3 = vector.load %arg4[%c0_3, %c0_4] : memref<1x128xf32, #tpu.memory_space<vmem>>, vector<1x128xf32>
    %4 = vector.broadcast %3 : vector<1x128xf32> to vector<16x128xf32>
    %5 = arith.addf %2, %4 : vector<16x128xf32>
    %6 = math.tanh %5 : vector<16x128xf32>
    %c0_5 = arith.constant 0 : index
    %c0_6 = arith.constant 0 : index
    %7 = vector.load %arg5[%c0_5, %c0_6] : memref<16x128xf32, #tpu.memory_space<vmem>>, vector<16x128xf32>
    tpu.vector_store %arg5[%c0_5, %c0_6], %6 {strides = array<i32>} : memref<16x128xf32, #tpu.memory_space<vmem>>, vector<16x128xf32>,
    return
  }
  func.func @transform_0(%arg0: i32, %arg1: i32) -> (i32, i32) {
    %c0_i32 = arith.constant 0 : i32
    %c0_i32_0 = arith.constant 0 : i32
    return %arg1, %c0_i32 : i32, i32
  }
  func.func @transform_1(%arg0: i32, %arg1: i32) -> (i32, i32) {
    %c0_i32 = arith.constant 0 : i32
    %c0_i32_0 = arith.constant 0 : i32
    return %arg0, %c0_i32 : i32, i32
  }
  func.func @transform_2(%arg0: i32, %arg1: i32) -> (i32, i32) {
    %c0_i32 = arith.constant 0 : i32
    %c0_i32_0 = arith.constant 0 : i32
    return %c0_i32, %arg0 : i32, i32
  }
  func.func @transform_3(%arg0: i32, %arg1: i32) -> (i32, i32) {
    %c0_i32 = arith.constant 0 : i32
    return %arg1, %arg0 : i32, i32
  }
}

</mosaic_0001>

<bundles_post_ra>
// kernel: tpu_custom_call.1
= control target key start
LH: loop header
LB: loop body
LE: loop exit
PB: predicated region body
PF: predicated region fallthrough
CT: control target
= control target key end

     0   :  { %8 = vsyncpa [#allocation3], 0  ;;  %s387_s0 = inlined_call_operand.hbm [shape: bf16[16,128], index: 0, kind: input, shape index: {}]   ;;  %s388_s1 = inlined_call_operand.hbm [shape: bf16[128,128], index: 1, kind: input, shape index: {}]   ;;  %s389_s2 = inlined_call_operand.vmem [shape: f32[1,128], index: 2, kind: input, shape index: {}]   ;;  %s390_s3 = inlined_call_operand.hbm [shape: f32[16,128], index: 3, kind: output, shape index: {}]  }
   0x1   :  { %9 = vsyncpa [#allocation6], 0 }
   0x2   :  { %10 = vsyncpa [#allocation4], 0  ;;  %s319_s12 = smov [#allocation2]   ;;  %s247_s16 = scalar_lea.hbm %s387_s0, 128 }
   0x3   :  { %s16_s13 = sshll.u32 %s319_s12, 4  ;;  %p248_p0 = scmp.ne.s32.totalorder %s387_s0, %s247_s16  ;;  %s17_s13 = int_to_ptr.vmem [resolvable:$true] %s16_s13 }
   0x4   :  { %p251_p1 = scmp.lt.u32.totalorder %s247_s16, %s387_s0 }
   0x6   :  { %p253_p2 = pnand %p251_p1, %p248_p0 }
   0x8   :  { %256 = shalt.err (!%p253_p2)
}
   0x9   :  { %s257_s21 = scalar_lea.vmem %s17_s13, 128  ;;  %p262_p4 = scmp.lt.s32.totalorder %s17_s13, %s17_s13 }
   0xa   :  { %p258_p3 = scmp.ne.s32.totalorder %s17_s13, %s257_s21  ;;  %p263_p5 = scmp.lt.s32.totalorder %s257_s21, %s257_s21 }
   0xc   :  { %p264_p6 = por %p263_p5, %p262_p4 }
   0xe   :  { %p265_p7 = pnand %p264_p6, %p258_p3 }
  0x10   :  { %268 = shalt.err (!%p265_p7)
}
  0x11   :  { %s320_s22 = smov 64   ;;  %s321_s23 = smov 4  }
  0x12   :  { %22 = dma.hbm_to_vmem [thread:$0]  %s387_s0, 128, %s17_s13, [#allocation3], %s320_s22, %s320_s22, %s321_s23  }
  0x13   :  { %s322_s26 = smov [#allocation5]   ;;  %s269_s30 = scalar_lea.hbm %s388_s1, 1024 }
  0x14   :  { %s28_s27 = sshll.u32 %s322_s26, 4  ;;  %p270_p8 = scmp.ne.s32.totalorder %s388_s1, %s269_s30  ;;  %s29_s27 = int_to_ptr.vmem [resolvable:$true] %s28_s27 }
  0x15   :  { %p273_p9 = scmp.lt.u32.totalorder %s269_s30, %s388_s1 }
  0x17   :  { %p275_p10 = pnand %p273_p9, %p270_p8 }
  0x19   :  { %278 = shalt.err (!%p275_p10)
}
  0x1a   :  { %s279_s8 = scalar_lea.vmem %s29_s27, 1024  ;;  %p284_p12 = scmp.lt.s32.totalorder %s29_s27, %s29_s27 }
  0x1b   :  { %p280_p11 = scmp.ne.s32.totalorder %s29_s27, %s279_s8  ;;  %p285_p13 = scmp.lt.s32.totalorder %s279_s8, %s279_s8 }
  0x1d   :  { %p286_p0 = por %p285_p13, %p284_p12 }
  0x1f   :  { %p287_p1 = pnand %p286_p0, %p280_p11 }
  0x21   :  { %290 = shalt.err (!%p287_p1)
}
  0x22   :  { %34 = dma.hbm_to_vmem [thread:$0]  %s388_s1, 1024, %s29_s27, [#allocation6], %s320_s22, %s320_s22, %s321_s23  }
  0x23   :  { %313 = dma.done.wait [#allocation3], 128  }
  0x24   :  { %314 = vsyncadd [#allocation3], 4294967168 }
  0x25   :  { %315 = dma.done.wait [#allocation6], 1024  }
  0x26   :  { %316 = vsyncadd [#allocation6], 4294966272  ;;  %v323_v0 = vmov 0.0   ;;  %vm324_vm0 = vmmov 0   ;;  %v234_v1 = vld [vmem:[#allocation5] sm:$0xff]   ;;  %v235_v2 = vld [vmem:[#allocation5 + $0x8] sm:$0xff]  }
  0x27   :  { %205 = vmatprep.subr.bf16.mxu0 %v323_v0  ;;  %221 = vmatprep.mubr.msk.bf16.mxu0 %vm324_vm0, %v323_v0  ;;  %v236_v3 = vld [vmem:[#allocation5 + $0x10] sm:$0xff]   ;;  %v237_v4 = vld [vmem:[#allocation5 + $0x18] sm:$0xff]   ;;  %v238_v5 = vld [vmem:[#allocation5 + $0x20] sm:$0xff]   ;;  %s325_s11 = smov [#allocation7]  }
  0x28   :  { %206 = vmatpush3.bf16.xpose.msra.mxu0 %v234_v1  ;;  %v239_v6 = vld [vmem:[#allocation5 + $0x28] sm:$0xff]   ;;  %v240_v7 = vld [vmem:[#allocation5 + $0x30] sm:$0xff]   ;;  %v241_v8 = vld [vmem:[#allocation5 + $0x38] sm:$0xff]   ;;  %s173_s12 = sshll.u32 %s325_s11, 4  ;;  %s174_s12 = int_to_ptr.vmem [resolvable:$true] %s173_s12 }
  0x29   :  { %207 = vmatprep.subr.bf16.mxu0 %v323_v0  ;;  %v242_v9 = vld [vmem:[#allocation2] sm:$0xff]   ;;  %s291_s13 = scalar_lea.vmem %s174_s12, 256  ;;  %p296_p3 = scmp.lt.s32.totalorder %s174_s12, %s174_s12 }
  0x2a   :  { %v186_v10 = vld [vmem:[%s389_s2] ss:$0 sm:$0xff]  ;;  %p292_p2 = scmp.ne.s32.totalorder %s174_s12, %s291_s13  ;;  %p297_p4 = scmp.lt.s32.totalorder %s291_s13, %s291_s13 }
  0x2c   :  { %p298_p5 = por %p297_p4, %p296_p3 }
  0x2e   :  { %p299_p6 = pnand %p298_p5, %p292_p2 }
  0x30   :  { %208 = vmatpush3.bf16.xpose.msra.mxu0 %v235_v2 }
  0x31   :  { %209 = vmatprep.subr.bf16.mxu0 %v323_v0 }
  0x38   :  { %210 = vmatpush3.bf16.xpose.msra.mxu0 %v236_v3 }
  0x39   :  { %211 = vmatprep.subr.bf16.mxu0 %v323_v0 }
  0x40   :  { %212 = vmatpush3.bf16.xpose.msra.mxu0 %v237_v4 }
  0x41   :  { %213 = vmatprep.subr.bf16.mxu0 %v323_v0 }
  0x48   :  { %214 = vmatpush3.bf16.xpose.msra.mxu0 %v238_v5 }
  0x49   :  { %215 = vmatprep.subr.bf16.mxu0 %v323_v0 }
  0x50   :  { %216 = vmatpush3.bf16.xpose.msra.mxu0 %v239_v6 }
  0x51   :  { %217 = vmatprep.subr.bf16.mxu0 %v323_v0 }
  0x58   :  { %218 = vmatpush3.bf16.xpose.msra.mxu0 %v240_v7 }
  0x59   :  { %219 = vmatprep.subr.bf16.mxu0 %v323_v0 }
  0x60   :  { %220 = vmatpush3.bf16.xpose.msra.mxu0 %v241_v8 }
  0x67   :  { %222 = vmatmul.mubr.bf16.vlgmr.msra.gmra.mrb[0].mxu0 %v242_v9 }
 0x13a   :  { %v157_v11 = vpop.f32.mrb[0].mxu0 }
 0x13b   :  { %v158_v12 = vadd.f32 %v186_v10, %v157_v11  ;;  %v223_v13 = vpop.f32.mrb[1].mxu0 }
 0x13c   :  { %v160_v14 = vpop.f32.mrb[2].mxu0 }
 0x13d   :  { %243 = vtanh.f32 %v158_v12  ;;  %v161_v15 = vadd.f32 %v186_v10, %v160_v14  ;;  %v224_v16 = vpop.f32.mrb[3].mxu0 }
 0x13f   :  { %245 = vtanh.f32 %v161_v15 }
 0x147   :  { %v244_v17 = vpop.eup %243 }
 0x148   :  { %166 = vst [vmem:[#allocation7] sm:$0xff] %v244_v17 }
 0x149   :  { %v246_v18 = vpop.eup %245 }
 0x14a   :  { %167 = vst [vmem:[#allocation7 + $0x8] sm:$0xff] %v246_v18 }
 0x14b   :  { %302 = shalt.err (!%p299_p6)
}
 0x14c   :  { %s303_s15 = scalar_lea.hbm %s390_s3, 256 }
 0x14d   :  { %p304_p7 = scmp.ne.s32.totalorder %s390_s3, %s303_s15  ;;  %p307_p8 = scmp.lt.u32.totalorder %s303_s15, %s390_s3 }
 0x14f   :  { %p309_p9 = pnand %p307_p8, %p304_p7 }
 0x151   :  { %312 = shalt.err (!%p309_p9)
}
 0x152   :  { %s326_s20 = smov 128   ;;  %s327_s21 = smov 8  }
 0x153   :  { %179 = dma.vmem_to_hbm [thread:$0]  %s174_s12, 256, %s390_s3, [#allocation4], %s326_s20, %s326_s20, %s327_s21  }
 0x154   :  { %317 = dma.done.wait [#allocation4], 256  }
 0x155   :  { %318 = vsyncadd [#allocation4], 4294967040 }
 0x156   :  { %183 = vsyncpa [#allocation3], 1 }
 0x157   :  { %184 = vsyncpa [#allocation6], 1 }
 0x158   :  { %185 = vsyncpa [#allocation4], 1 }

</bundles_post_ra>
